<compile_context>
chip_gen: v7x
topology: tpu7x:2x2x1
jax: 0.10.0
libtpu: 0.0.40
codegen_flags: <defaults>
</compile_context>

<pallas_src>
import jax
import jax.numpy as jnp
from jax.experimental import pallas as pl
from jax.experimental.pallas import tpu as pltpu

RAW_FEATURES = 119   # from Model.__init__
NUM_CLASSES = 2      # from Model.__init__
HIDDEN = 32          # logical latent width of message passing
F_PAD = 128          # raw-feature dim zero-padded to a full lane width
HID_PAD = 128        # hidden dim zero-padded to a full lane width (lane-dense vregs)
C_PAD = 128          # class dim zero-padded to a full lane width, sliced back outside


def mpnn_kernel(x_ref, a_ref, mask_ref,
                wl_ref, bl_ref,
                w1_ref, b1_ref, w2_ref, b2_ref, w3_ref, b3_ref,
                wro_ref, bro_ref,
                out_ref):
    """One grid step == one graph of the batch."""
    # 1) lifting layer (no activation). One-hot x is exact in bf16; upcast and
    #    run the lift itself in f32 so it stays exact.
    # TODO(synk): replace the one-hot lift matmul with an int-id embedding
    # gather of W_lift rows to remove the one-hot HBM traffic entirely.
    x = x_ref[0].astype(jnp.float32)                          # (MAXN, F_PAD)
    h = jnp.dot(x, wl_ref[...],
                preferred_element_type=jnp.float32) + bl_ref[...]

    # 2) three MP layers: aggregate neighbor messages (A @ h), linear, ReLU.
    a = a_ref[0]                                              # (MAXN, MAXN) bf16 (0/1 exact)
    for w_ref, b_ref in ((w1_ref, b1_ref), (w2_ref, b2_ref), (w3_ref, b3_ref)):
        msg = jnp.dot(a, h.astype(jnp.bfloat16),
                      preferred_element_type=jnp.float32)     # bf16 MXU, f32 accumulate
        h = jax.nn.relu(
            jnp.dot(msg, w_ref[...], preferred_element_type=jnp.float32)
            + b_ref[...])

    # 3) readout, pooled-first:
    #    sum_valid(h_n @ W_ro + b_ro) == (mask @ h) @ W_ro + n_valid * b_ro
    mask = mask_ref[0]                                        # (1, MAXN) f32 {0,1}
    pooled = jnp.dot(mask, h, preferred_element_type=jnp.float32)   # (1, HID_PAD)
    n_valid = jnp.sum(mask)                                   # per-graph node count
    out_ref[0] = (jnp.dot(pooled, wro_ref[...],
                          preferred_element_type=jnp.float32)
                  + n_valid * bro_ref[...])


def mpnn_forward(x, adj, mask, params):
    """x:    (B, MAXN, 119) one-hot node features (padded node rows are zero)
       adj:  (B, MAXN, MAXN) per-graph adjacency (padded rows/cols are zero)
       mask: (B, MAXN) {0,1} valid-node mask.
       Returns logits (B, NUM_CLASSES)."""
    batch, maxn, _ = x.shape

    # Host glue: lane-pad feature/hidden/class dims (exact zero-padding),
    # bf16 the 0/1-valued inputs to halve their HBM traffic.
    x_p = jnp.pad(x.astype(jnp.float32),
                  ((0, 0), (0, 0), (0, F_PAD - RAW_FEATURES))).astype(jnp.bfloat16)
    a_p = adj.astype(jnp.bfloat16)
    m_p = mask.astype(jnp.float32).reshape(batch, 1, maxn)

    dh = HID_PAD - HIDDEN
    wl = jnp.pad(params["w_lift"], ((0, F_PAD - RAW_FEATURES), (0, dh)))
    bl = jnp.pad(params["b_lift"], ((0, 0), (0, dh)))
    w1 = jnp.pad(params["w1"], ((0, dh), (0, dh)))
    b1 = jnp.pad(params["b1"], ((0, 0), (0, dh)))
    w2 = jnp.pad(params["w2"], ((0, dh), (0, dh)))
    b2 = jnp.pad(params["b2"], ((0, 0), (0, dh)))
    w3 = jnp.pad(params["w3"], ((0, dh), (0, dh)))
    b3 = jnp.pad(params["b3"], ((0, 0), (0, dh)))
    wro = jnp.pad(params["w_ro"], ((0, dh), (0, C_PAD - NUM_CLASSES)))
    bro = jnp.pad(params["b_ro"], ((0, 0), (0, C_PAD - NUM_CLASSES)))

    const2d = lambda g: (0, 0)   # weights/biases: same block every step -> stay resident

    out = pl.pallas_call(
        mpnn_kernel,
        out_shape=jax.ShapeDtypeStruct((batch, 1, C_PAD), jnp.float32),
        grid=(batch,),
        in_specs=[
            pl.BlockSpec((1, maxn, F_PAD), lambda g: (g, 0, 0)),   # x       (one graph)
            pl.BlockSpec((1, maxn, maxn), lambda g: (g, 0, 0)),    # adj     (one graph)
            pl.BlockSpec((1, 1, maxn), lambda g: (g, 0, 0)),       # mask    (one graph)
            pl.BlockSpec((F_PAD, HID_PAD), const2d),               # w_lift
            pl.BlockSpec((1, HID_PAD), const2d),                   # b_lift
            pl.BlockSpec((HID_PAD, HID_PAD), const2d),             # w1
            pl.BlockSpec((1, HID_PAD), const2d),                   # b1
            pl.BlockSpec((HID_PAD, HID_PAD), const2d),             # w2
            pl.BlockSpec((1, HID_PAD), const2d),                   # b2
            pl.BlockSpec((HID_PAD, HID_PAD), const2d),             # w3
            pl.BlockSpec((1, HID_PAD), const2d),                   # b3
            pl.BlockSpec((HID_PAD, C_PAD), const2d),               # w_ro
            pl.BlockSpec((1, C_PAD), const2d),                     # b_ro
        ],
        out_specs=pl.BlockSpec((1, 1, C_PAD), lambda g: (g, 0, 0)),
        # Per-graph tiles are tiny (O(MAXN^2 + MAXN*128) bytes), far below the
        # default scoped-VMEM limit on v5e/v6e/v7x; bump vmem_limit_bytes only
        # if MAXN grows into the thousands.
        compiler_params=pltpu.CompilerParams(
            dimension_semantics=("parallel",)),   # graphs are independent -> 2nd TC on v7x
    )(x_p, a_p, m_p, wl, bl, w1, b1, w2, b2, w3, b3, wro, bro)

    return out[:, 0, :NUM_CLASSES]


def mpnn_reference(x, adj, mask, params):
    """Pure-JAX f32 reference of the original module's forward pass."""
    h = jnp.einsum("bnf,fh->bnh", x, params["w_lift"]) + params["b_lift"]
    for i in (1, 2, 3):
        m = jnp.einsum("bnm,bmh->bnh", adj, h)
        h = jax.nn.relu(
            jnp.einsum("bnh,hk->bnk", m, params[f"w{i}"]) + params[f"b{i}"])
    node_out = jnp.einsum("bnh,hc->bnc", h, params["w_ro"]) + params["b_ro"]
    return jnp.einsum("bn,bnc->bc", mask, node_out)   # dgl.sum_nodes over valid nodes


def init_params(key):
    ks = jax.random.split(key, 5)

    def lin(k, fan_in, fan_out):
        scale = 1.0 / jnp.sqrt(fan_in)
        return jax.random.uniform(k, (fan_in, fan_out), jnp.float32, -scale, scale)

    return {
        "w_lift": lin(ks[0], RAW_FEATURES, HIDDEN),
        "b_lift": jnp.zeros((1, HIDDEN), jnp.float32),
        "w1": lin(ks[1], HIDDEN, HIDDEN), "b1": jnp.zeros((1, HIDDEN), jnp.float32),
        "w2": lin(ks[2], HIDDEN, HIDDEN), "b2": jnp.zeros((1, HIDDEN), jnp.float32),
        "w3": lin(ks[3], HIDDEN, HIDDEN), "b3": jnp.zeros((1, HIDDEN), jnp.float32),
        "w_ro": lin(ks[4], HIDDEN, NUM_CLASSES),
        "b_ro": jnp.zeros((1, NUM_CLASSES), jnp.float32),
    }


if __name__ == "__main__":
    key = jax.random.PRNGKey(0)
    k_param, k_feat, k_adj = jax.random.split(key, 3)

    BATCH = 2
    MAXN = 8                                   # pad target: max nodes per graph
    graph_sizes = jnp.array([8, 6])            # second graph has 2 padded nodes

    params = init_params(k_param)

    # valid-node mask (B, MAXN)
    mask = (jnp.arange(MAXN)[None, :] < graph_sizes[:, None]).astype(jnp.float32)

    # one-hot atom-type node features, zeroed on padded rows
    atom_types = jax.random.randint(k_feat, (BATCH, MAXN), 0, RAW_FEATURES)
    x = jax.nn.one_hot(atom_types, RAW_FEATURES, dtype=jnp.float32) * mask[..., None]

    # per-graph symmetric 0/1 adjacency with self loops, zeroed outside valid nodes
    r = jax.random.bernoulli(k_adj, 0.4, (BATCH, MAXN, MAXN)).astype(jnp.float32)
    adj = jnp.clip(r + jnp.swapaxes(r, 1, 2) + jnp.eye(MAXN)[None], 0.0, 1.0)
    adj = adj * mask[:, :, None] * mask[:, None, :]

    logits = jax.jit(mpnn_forward)(x, adj, mask, params)
    jax.block_until_ready(logits)
    assert logits.shape == (BATCH, NUM_CLASSES)

    ref = mpnn_reference(x, adj, mask, params)
    assert jnp.allclose(logits, ref, rtol=5e-2, atol=5e-2), (logits, ref)
    print("KERNEL_OK")
</pallas_src>

<mosaic_0001>
module attributes {stable_mosaic.version = 11 : i64} {
  func.func @mpnn_kernel(%arg0: i32, %arg1: memref<1x8x128xbf16, #tpu.memory_space<vmem>>, %arg2: memref<1x8x8xbf16, #tpu.memory_space<vmem>>, %arg3: memref<1x1x8xf32, #tpu.memory_space<vmem>>, %arg4: memref<128x128xf32, #tpu.memory_space<vmem>>, %arg5: memref<1x128xf32, #tpu.memory_space<vmem>>, %arg6: memref<128x128xf32, #tpu.memory_space<vmem>>, %arg7: memref<1x128xf32, #tpu.memory_space<vmem>>, %arg8: memref<128x128xf32, #tpu.memory_space<vmem>>, %arg9: memref<1x128xf32, #tpu.memory_space<vmem>>, %arg10: memref<128x128xf32, #tpu.memory_space<vmem>>, %arg11: memref<1x128xf32, #tpu.memory_space<vmem>>, %arg12: memref<128x128xf32, #tpu.memory_space<vmem>>, %arg13: memref<1x128xf32, #tpu.memory_space<vmem>>, %arg14: memref<1x1x128xf32, #tpu.memory_space<vmem>>) attributes {dimension_semantics = [#tpu.dimension_semantics<parallel>], iteration_bounds = array<i64: 2>, scalar_prefetch = 0 : i64, scratch_operands = 0 : i64, tpu.core_type = #tpu.core_type<tc>, window_params = [{transform_indices = @transform_0, window_bounds = array<i64: 1, 8, 128>}, {transform_indices = @transform_1, window_bounds = array<i64: 1, 8, 8>}, {transform_indices = @transform_2, window_bounds = array<i64: 1, 1, 8>}, {pipeline_mode = #tpu.pipeline_mode<synchronous>, transform_indices = @transform_3, window_bounds = array<i64: 128, 128>}, {pipeline_mode = #tpu.pipeline_mode<synchronous>, transform_indices = @transform_4, window_bounds = array<i64: 1, 128>}, {pipeline_mode = #tpu.pipeline_mode<synchronous>, transform_indices = @transform_5, window_bounds = array<i64: 128, 128>}, {pipeline_mode = #tpu.pipeline_mode<synchronous>, transform_indices = @transform_6, window_bounds = array<i64: 1, 128>}, {pipeline_mode = #tpu.pipeline_mode<synchronous>, transform_indices = @transform_7, window_bounds = array<i64: 128, 128>}, {pipeline_mode = #tpu.pipeline_mode<synchronous>, transform_indices = @transform_8, window_bounds = array<i64: 1, 128>}, {pipeline_mode = #tpu.pipeline_mode<synchronous>, transform_indices = @transform_9, window_bounds = array<i64: 128, 128>}, {pipeline_mode = #tpu.pipeline_mode<synchronous>, transform_indices = @transform_10, window_bounds = array<i64: 1, 128>}, {pipeline_mode = #tpu.pipeline_mode<synchronous>, transform_indices = @transform_11, window_bounds = array<i64: 128, 128>}, {pipeline_mode = #tpu.pipeline_mode<synchronous>, transform_indices = @transform_12, window_bounds = array<i64: 1, 128>}, {transform_indices = @transform_13, window_bounds = array<i64: 1, 1, 128>}]} {
    %c0 = arith.constant 0 : index
    %c0_0 = arith.constant 0 : index
    %c0_1 = arith.constant 0 : index
    %0 = vector.load %arg1[%c0, %c0_0, %c0_1] : memref<1x8x128xbf16, #tpu.memory_space<vmem>>, vector<1x8x128xbf16>
    %1 = vector.shape_cast %0 : vector<1x8x128xbf16> to vector<8x128xbf16>
    %2 = arith.extf %1 : vector<8x128xbf16> to vector<8x128xf32>
    %c0_2 = arith.constant 0 : index
    %c0_3 = arith.constant 0 : index
    %3 = vector.load %arg4[%c0_2, %c0_3] : memref<128x128xf32, #tpu.memory_space<vmem>>, vector<128x128xf32>
    %cst = arith.constant dense<0.000000e+00> : vector<8x128xf32>
    %4 = tpu.matmul %2, %3, %cst {dimension_numbers = #tpu.dot_dimension_numbers<[1], [0], [0], [1], [0, 0, 1, 1], [], []>} : vector<8x128xf32>, vector<128x128xf32>, vector<8x128xf32> -> vector<8x128xf32>
    %c0_4 = arith.constant 0 : index
    %c0_5 = arith.constant 0 : index
    %5 = vector.load %arg5[%c0_4, %c0_5] : memref<1x128xf32, #tpu.memory_space<vmem>>, vector<1x128xf32>
    %6 = vector.broadcast %5 : vector<1x128xf32> to vector<8x128xf32>
    %7 = arith.addf %4, %6 : vector<8x128xf32>
    %c0_6 = arith.constant 0 : index
    %c0_7 = arith.constant 0 : index
    %c0_8 = arith.constant 0 : index
    %8 = vector.load %arg2[%c0_6, %c0_7, %c0_8] : memref<1x8x8xbf16, #tpu.memory_space<vmem>>, vector<1x8x8xbf16>
    %9 = vector.shape_cast %8 : vector<1x8x8xbf16> to vector<8x8xbf16>
    %10 = arith.truncf %7 : vector<8x128xf32> to vector<8x128xbf16>
    %cst_9 = arith.constant dense<0.000000e+00> : vector<8x128xf32>
    %11 = tpu.matmul %9, %10, %cst_9 {dimension_numbers = #tpu.dot_dimension_numbers<[1], [0], [0], [1], [0, 0, 1, 1], [], []>} : vector<8x8xbf16>, vector<8x128xbf16>, vector<8x128xf32> -> vector<8x128xf32>
    %c0_10 = arith.constant 0 : index
    %c0_11 = arith.constant 0 : index
    %12 = vector.load %arg6[%c0_10, %c0_11] : memref<128x128xf32, #tpu.memory_space<vmem>>, vector<128x128xf32>
    %cst_12 = arith.constant dense<0.000000e+00> : vector<8x128xf32>
    %13 = tpu.matmul %11, %12, %cst_12 {dimension_numbers = #tpu.dot_dimension_numbers<[1], [0], [0], [1], [0, 0, 1, 1], [], []>} : vector<8x128xf32>, vector<128x128xf32>, vector<8x128xf32> -> vector<8x128xf32>
    %c0_13 = arith.constant 0 : index
    %c0_14 = arith.constant 0 : index
    %14 = vector.load %arg7[%c0_13, %c0_14] : memref<1x128xf32, #tpu.memory_space<vmem>>, vector<1x128xf32>
    %15 = vector.broadcast %14 : vector<1x128xf32> to vector<8x128xf32>
    %16 = arith.addf %13, %15 : vector<8x128xf32>
    %cst_15 = arith.constant 0.000000e+00 : f32
    %17 = vector.broadcast %cst_15 : f32 to vector<8x128xf32>
    %18 = arith.maximumf %16, %17 : vector<8x128xf32>
    %19 = arith.truncf %18 : vector<8x128xf32> to vector<8x128xbf16>
    %cst_16 = arith.constant dense<0.000000e+00> : vector<8x128xf32>
    %20 = tpu.matmul %9, %19, %cst_16 {dimension_numbers = #tpu.dot_dimension_numbers<[1], [0], [0], [1], [0, 0, 1, 1], [], []>} : vector<8x8xbf16>, vector<8x128xbf16>, vector<8x128xf32> -> vector<8x128xf32>
    %c0_17 = arith.constant 0 : index
    %c0_18 = arith.constant 0 : index
    %21 = vector.load %arg8[%c0_17, %c0_18] : memref<128x128xf32, #tpu.memory_space<vmem>>, vector<128x128xf32>
    %cst_19 = arith.constant dense<0.000000e+00> : vector<8x128xf32>
    %22 = tpu.matmul %20, %21, %cst_19 {dimension_numbers = #tpu.dot_dimension_numbers<[1], [0], [0], [1], [0, 0, 1, 1], [], []>} : vector<8x128xf32>, vector<128x128xf32>, vector<8x128xf32> -> vector<8x128xf32>
    %c0_20 = arith.constant 0 : index
    %c0_21 = arith.constant 0 : index
    %23 = vector.load %arg9[%c0_20, %c0_21] : memref<1x128xf32, #tpu.memory_space<vmem>>, vector<1x128xf32>
    %24 = vector.broadcast %23 : vector<1x128xf32> to vector<8x128xf32>
    %25 = arith.addf %22, %24 : vector<8x128xf32>
    %cst_22 = arith.constant 0.000000e+00 : f32
    %26 = vector.broadcast %cst_22 : f32 to vector<8x128xf32>
    %27 = arith.maximumf %25, %26 : vector<8x128xf32>
    %28 = arith.truncf %27 : vector<8x128xf32> to vector<8x128xbf16>
    %cst_23 = arith.constant dense<0.000000e+00> : vector<8x128xf32>
    %29 = tpu.matmul %9, %28, %cst_23 {dimension_numbers = #tpu.dot_dimension_numbers<[1], [0], [0], [1], [0, 0, 1, 1], [], []>} : vector<8x8xbf16>, vector<8x128xbf16>, vector<8x128xf32> -> vector<8x128xf32>
    %c0_24 = arith.constant 0 : index
    %c0_25 = arith.constant 0 : index
    %30 = vector.load %arg10[%c0_24, %c0_25] : memref<128x128xf32, #tpu.memory_space<vmem>>, vector<128x128xf32>
    %cst_26 = arith.constant dense<0.000000e+00> : vector<8x128xf32>
    %31 = tpu.matmul %29, %30, %cst_26 {dimension_numbers = #tpu.dot_dimension_numbers<[1], [0], [0], [1], [0, 0, 1, 1], [], []>} : vector<8x128xf32>, vector<128x128xf32>, vector<8x128xf32> -> vector<8x128xf32>
    %c0_27 = arith.constant 0 : index
    %c0_28 = arith.constant 0 : index
    %32 = vector.load %arg11[%c0_27, %c0_28] : memref<1x128xf32, #tpu.memory_space<vmem>>, vector<1x128xf32>
    %33 = vector.broadcast %32 : vector<1x128xf32> to vector<8x128xf32>
    %34 = arith.addf %31, %33 : vector<8x128xf32>
    %cst_29 = arith.constant 0.000000e+00 : f32
    %35 = vector.broadcast %cst_29 : f32 to vector<8x128xf32>
    %36 = arith.maximumf %34, %35 : vector<8x128xf32>
    %c0_30 = arith.constant 0 : index
    %c0_31 = arith.constant 0 : index
    %c0_32 = arith.constant 0 : index
    %37 = vector.load %arg3[%c0_30, %c0_31, %c0_32] : memref<1x1x8xf32, #tpu.memory_space<vmem>>, vector<1x1x8xf32>
    %38 = vector.shape_cast %37 : vector<1x1x8xf32> to vector<1x8xf32>
    %cst_33 = arith.constant dense<0.000000e+00> : vector<1x128xf32>
    %39 = tpu.matmul %38, %36, %cst_33 {dimension_numbers = #tpu.dot_dimension_numbers<[1], [0], [0], [1], [0, 0, 1, 1], [], []>} : vector<1x8xf32>, vector<8x128xf32>, vector<1x128xf32> -> vector<1x128xf32>
    %40 = vector.shape_cast %38 : vector<1x8xf32> to vector<1x1x8xf32>
    %cst_34 = arith.constant dense<0.000000e+00> : vector<1xf32>
    %41 = vector.multi_reduction <add>, %40, %cst_34 [1, 2] : vector<1x1x8xf32> to vector<1xf32>
    %42 = vector.shape_cast %41 : vector<1xf32> to vector<1x1x1xf32>
    %43 = vector.extract %42[0, 0, 0] : f32 from vector<1x1x1xf32>
    %c0_35 = arith.constant 0 : index
    %c0_36 = arith.constant 0 : index
    %44 = vector.load %arg12[%c0_35, %c0_36] : memref<128x128xf32, #tpu.memory_space<vmem>>, vector<128x128xf32>
    %cst_37 = arith.constant dense<0.000000e+00> : vector<1x128xf32>
    %45 = tpu.matmul %39, %44, %cst_37 {dimension_numbers = #tpu.dot_dimension_numbers<[1], [0], [0], [1], [0, 0, 1, 1], [], []>} : vector<1x128xf32>, vector<128x128xf32>, vector<1x128xf32> -> vector<1x128xf32>
    %c0_38 = arith.constant 0 : index
    %c0_39 = arith.constant 0 : index
    %46 = vector.load %arg13[%c0_38, %c0_39] : memref<1x128xf32, #tpu.memory_space<vmem>>, vector<1x128xf32>
    %47 = vector.broadcast %43 : f32 to vector<1x128xf32>
    %48 = arith.mulf %47, %46 : vector<1x128xf32>
    %49 = arith.addf %45, %48 : vector<1x128xf32>
    %c0_40 = arith.constant 0 : index
    %c0_41 = arith.constant 0 : index
    %c0_42 = arith.constant 0 : index
    %50 = vector.load %arg14[%c0_40, %c0_41, %c0_42] : memref<1x1x128xf32, #tpu.memory_space<vmem>>, vector<1x1x128xf32>
    %51 = vector.shape_cast %50 : vector<1x1x128xf32> to vector<1x128xf32>
    %52 = vector.shape_cast %49 : vector<1x128xf32> to vector<1x1x128xf32>
    tpu.vector_store %arg14[%c0_40, %c0_41, %c0_42], %52 {strides = array<i32>} : memref<1x1x128xf32, #tpu.memory_space<vmem>>, vector<1x1x128xf32>,
    return
  }
  func.func @transform_0(%arg0: i32) -> (i32, i32, i32) {
    %c0_i32 = arith.constant 0 : i32
    %c0_i32_0 = arith.constant 0 : i32
    %c0_i32_1 = arith.constant 0 : i32
    return %arg0, %c0_i32, %c0_i32_0 : i32, i32, i32
  }
  func.func @transform_1(%arg0: i32) -> (i32, i32, i32) {
    %c0_i32 = arith.constant 0 : i32
    %c0_i32_0 = arith.constant 0 : i32
    %c0_i32_1 = arith.constant 0 : i32
    return %arg0, %c0_i32, %c0_i32_0 : i32, i32, i32
  }
  func.func @transform_2(%arg0: i32) -> (i32, i32, i32) {
    %c0_i32 = arith.constant 0 : i32
    %c0_i32_0 = arith.constant 0 : i32
    %c0_i32_1 = arith.constant 0 : i32
    return %arg0, %c0_i32, %c0_i32_0 : i32, i32, i32
  }
  func.func @transform_3(%arg0: i32) -> (i32, i32) {
    %c0_i32 = arith.constant 0 : i32
    %c0_i32_0 = arith.constant 0 : i32
    %c0_i32_1 = arith.constant 0 : i32
    return %c0_i32, %c0_i32_0 : i32, i32
  }
  func.func @transform_4(%arg0: i32) -> (i32, i32) {
    %c0_i32 = arith.constant 0 : i32
    %c0_i32_0 = arith.constant 0 : i32
    %c0_i32_1 = arith.constant 0 : i32
    return %c0_i32, %c0_i32_0 : i32, i32
  }
  func.func @transform_5(%arg0: i32) -> (i32, i32) {
    %c0_i32 = arith.constant 0 : i32
    %c0_i32_0 = arith.constant 0 : i32
    %c0_i32_1 = arith.constant 0 : i32
    return %c0_i32, %c0_i32_0 : i32, i32
  }
  func.func @transform_6(%arg0: i32) -> (i32, i32) {
    %c0_i32 = arith.constant 0 : i32
    %c0_i32_0 = arith.constant 0 : i32
    %c0_i32_1 = arith.constant 0 : i32
    return %c0_i32, %c0_i32_0 : i32, i32
  }
  func.func @transform_7(%arg0: i32) -> (i32, i32) {
    %c0_i32 = arith.constant 0 : i32
    %c0_i32_0 = arith.constant 0 : i32
    %c0_i32_1 = arith.constant 0 : i32
    return %c0_i32, %c0_i32_0 : i32, i32
  }
  func.func @transform_8(%arg0: i32) -> (i32, i32) {
    %c0_i32 = arith.constant 0 : i32
    %c0_i32_0 = arith.constant 0 : i32
    %c0_i32_1 = arith.constant 0 : i32
    return %c0_i32, %c0_i32_0 : i32, i32
  }
  func.func @transform_9(%arg0: i32) -> (i32, i32) {
    %c0_i32 = arith.constant 0 : i32
    %c0_i32_0 = arith.constant 0 : i32
    %c0_i32_1 = arith.constant 0 : i32
    return %c0_i32, %c0_i32_0 : i32, i32
  }
  func.func @transform_10(%arg0: i32) -> (i32, i32) {
    %c0_i32 = arith.constant 0 : i32
    %c0_i32_0 = arith.constant 0 : i32
    %c0_i32_1 = arith.constant 0 : i32
    return %c0_i32, %c0_i32_0 : i32, i32
  }
  func.func @transform_11(%arg0: i32) -> (i32, i32) {
    %c0_i32 = arith.constant 0 : i32
    %c0_i32_0 = arith.constant 0 : i32
    %c0_i32_1 = arith.constant 0 : i32
    return %c0_i32, %c0_i32_0 : i32, i32
  }
  func.func @transform_12(%arg0: i32) -> (i32, i32) {
    %c0_i32 = arith.constant 0 : i32
    %c0_i32_0 = arith.constant 0 : i32
    %c0_i32_1 = arith.constant 0 : i32
    return %c0_i32, %c0_i32_0 : i32, i32
  }
  func.func @transform_13(%arg0: i32) -> (i32, i32, i32) {
    %c0_i32 = arith.constant 0 : i32
    %c0_i32_0 = arith.constant 0 : i32
    %c0_i32_1 = arith.constant 0 : i32
    return %arg0, %c0_i32, %c0_i32_0 : i32, i32, i32
  }
}

</mosaic_0001>

<bundles_post_ra>
// kernel: mpnn_forward.1
= control target key start
LH: loop header
LB: loop body
LE: loop exit
PB: predicated region body
PF: predicated region fallthrough
CT: control target
= control target key end

     0   :  { %18 = vsyncpa [#allocation3], 0  ;;  %s2295_s0 = inlined_call_operand.vmem [shape: bf16[2,8,128], index: 0, kind: input, shape index: {}]   ;;  %s2296_s1 = inlined_call_operand.vmem [shape: bf16[2,8,8], index: 1, kind: input, shape index: {}]   ;;  %s2297_s2 = inlined_call_operand.vmem [shape: f32[2,1,8], index: 2, kind: input, shape index: {}]   ;;  %s2298_s3 = inlined_call_operand.vmem [shape: f32[128,128], index: 3, kind: input, shape index: {}]   ;;  %s2299_s4 = inlined_call_operand.vmem [shape: f32[1,128], index: 4, kind: input, shape index: {}]   ;;  %s2300_s5 = inlined_call_operand.vmem [shape: f32[128,128], index: 5, kind: input, shape index: {}]   ;;  %s2301_s6 = inlined_call_operand.vmem [shape: f32[1,128], index: 6, kind: input, shape index: {}]   ;;  %s2302_s7 = inlined_call_operand.vmem [shape: f32[128,128], index: 7, kind: input, shape index: {}]   ;;  %s2303_s8 = inlined_call_operand.vmem [shape: f32[1,128], index: 8, kind: input, shape index: {}]   ;;  %s2304_s9 = inlined_call_operand.vmem [shape: f32[128,128], index: 9, kind: input, shape index: {}]   ;;  %s2305_s10 = inlined_call_operand.vmem [shape: f32[1,128], index: 10, kind: input, shape index: {}]   ;;  %s2306_s11 = inlined_call_operand.vmem [shape: f32[128,128], index: 11, kind: input, shape index: {}]   ;;  %s2307_s12 = inlined_call_operand.vmem [shape: f32[1,128], index: 12, kind: input, shape index: {}]   ;;  %s2308_s13 = inlined_call_operand.hbm [shape: f32[2,1,128], index: 13, kind: output, shape index: {}]  }
   0x1   :  { %20 = vsyncpa [#allocation3 + $0x1], 0  ;;  %s1856_s25 = smov 0   ;;  %s1858_s26 = smov 0  }
   0x2   :  { %s1860_s27 = smov 0   ;;  %s1862_s28 = smov 0  }
   0x3 LB: > { %2312 = sst [smem:[#allocation5_spill]] %s1776_s27  ;;  %s1877_s29 = sadd.s32 4294967295, %s1780_s28   ;;  %s1780_s28 = sphi %s1862_s28, %s2317_s28   ;;  %s1776_s27 = sphi %s1860_s27, %s2319_s27   ;;  %s1772_s26 = sphi %s1858_s26, %s2321_s26   ;;  %s1768_s25 = sphi %s1856_s25, %s2320_s25  }
   0x4   : > { %s1246_s30 = sadd.s32 4294967294, %s1780_s28   ;;  %s1881_s14 = sadd.s32 1, %s1780_s28  }
   0x5   : > { %2313 = sst [smem:[#allocation6_spill]] %s1881_s14  ;;  %s321_s15 = sadd.s32 1, %s1776_s27 }
   0x6   : > { %s318_s16 = ssub.s32 %s1780_s28, %s1881_s14  ;;  %p331_p0 = scmp.ne.s32.totalorder %s1776_s27, %s1772_s26 }
   0x7   : > { %p319_p1 = scmp.eq.s32.totalorder %s318_s16, 0  ;;  %p332_p2 = scmp.eq.s32.totalorder %s1877_s29, 1 }
   0x8   : > { %p337_p3 = scmp.ne.s32.totalorder %s1772_s26, %s1768_s25  ;;  %p338_p4 = scmp.eq.s32.totalorder %s1246_s30, 1 }
   0x9   : > { %s1892_s17 = scalar_select %p319_p1, %s1776_s27, %s321_s15  }
   0xa   : > { %p1894_p5 = por %p332_p2, %p331_p0  ;;  %p1898_p6 = por %p338_p4, %p337_p3 }
   0xb   : > { %2314 = sst [smem:[#allocation7_spill]] %s1892_s17  ;;  %p1249_p7 = scmp.ge.s32.totalorder %s1780_s28, 1 }
   0xc   : > { %p406_p8 = scmp.lt.s32.totalorder %s1780_s28, 3 }
   0xe   : > { %p407_p9 = pnand %p1249_p7, %p406_p8 }
   0xf   : > { %v469_v0 = vld [vmem:[%s2298_s3] sm:$0xff] (!%p407_p9)  ;;  %v470_v1 = vld [vmem:[%s2298_s3 + $0x8] sm:$0xff] (!%p407_p9)  ;;  %v471_v2 = vld [vmem:[%s2298_s3 + $0x10] sm:$0xff] (!%p407_p9)  ;;  %v1782_v3 = vmov (!%p407_p9), 0.0|0.0   ;;  %vm1783_vm0 = vmmov (!%p407_p9), 0   ;;  %v1784_v6 = vmov (!%p407_p9), 0.0  }
  0x10   : > { %410 = sbr.rel (%p407_p9) target bundleno = 2006 (0x7d6), region = 72  ;;  %1554 = vmatprep.subr.bf16.mxu0 (!%p407_p9), %v1782_v3  ;;  %v1555_v4 = vpack.c.bf16 (!%p407_p9), %v470_v1, %v469_v0  ;;  %v472_v5 = vld [vmem:[%s2298_s3 + $0x18] sm:$0xff] (!%p407_p9)  ;;  %1388 = vmatprep.mubr.msk.f32.mxu0 (!%p407_p9), %vm1783_vm0, %v1784_v6  ;;  %v473_v8 = vld [vmem:[%s2298_s3 + $0x20] sm:$0xff] (!%p407_p9)  ;;  %v474_v9 = vld [vmem:[%s2298_s3 + $0x28] sm:$0xff] (!%p407_p9)  ;;  %p455_p10 = scmp.lt.s32.totalorder (!%p407_p9), %s1877_s29, 1  ;;  %vm568_vm1 = vcmask (!%p407_p9), 1043456  }
  0x11   : > { %1391 = vmatprep.subr.bf16.mxu1 (!%p407_p9), %v1784_v6  ;;  %1393 = vmatprep.mubr.msk.bf16.mxu1 (!%p407_p9), %vm1783_vm0, %v1784_v6  ;;  %v1558_v7 = vpack.c.bf16 (!%p407_p9), %v472_v5, %v471_v2  ;;  %v1561_v10 = vpack.c.bf16 (!%p407_p9), %v474_v9, %v473_v8  ;;  %v475_v11 = vld [vmem:[%s2298_s3 + $0x30] sm:$0xff] (!%p407_p9)  ;;  %v476_v12 = vld [vmem:[%s2298_s3 + $0x38] sm:$0xff] (!%p407_p9)  ;;  %v477_v14 = vld [vmem:[%s2298_s3 + $0x40] sm:$0xff] (!%p407_p9)  ;;  %vm564_vm2 = vcmask (!%p407_p9), 64512   ;;  %vm1056_vm3 = vcmask (!%p407_p9), 57344   ;;  %s1260_s15 = sshll.u32 (!%p407_p9), %s1877_s29, 4 }
  0x12   : > { %1556 = vmatpush3.bf16.msra.mxu0 (!%p407_p9), %v1555_v4  ;;  %v1564_v13 = vpack.c.bf16 (!%p407_p9), %v476_v12, %v475_v11  ;;  %v478_v15 = vld [vmem:[%s2298_s3 + $0x48] sm:$0xff] (!%p407_p9)  ;;  %v479_v17 = vld [vmem:[%s2298_s3 + $0x50] sm:$0xff] (!%p407_p9)  ;;  %v480_v18 = vld [vmem:[%s2298_s3 + $0x58] sm:$0xff] (!%p407_p9)  ;;  %s2253_s27 = scalar_lea.hbm (!%p407_p9), %s2308_s13, %s1260_s15 }
  0x13   : > { %1557 = vmatprep.subr.bf16.mxu0 (!%p407_p9), %v1782_v3  ;;  %v1567_v16 = vpack.c.bf16 (!%p407_p9), %v478_v15, %v477_v14  ;;  %v1570_v19 = vpack.c.bf16 (!%p407_p9), %v480_v18, %v479_v17  ;;  %v481_v20 = vld [vmem:[%s2298_s3 + $0x60] sm:$0xff] (!%p407_p9)  ;;  %v482_v21 = vld [vmem:[%s2298_s3 + $0x68] sm:$0xff] (!%p407_p9)  ;;  %v483_v23 = vld [vmem:[%s2298_s3 + $0x70] sm:$0xff] (!%p407_p9) }
  0x14   : > { %v1573_v22 = vpack.c.bf16 (!%p407_p9), %v482_v21, %v481_v20  ;;  %v484_v24 = vld [vmem:[%s2298_s3 + $0x78] sm:$0xff] (!%p407_p9)  ;;  %v1252_v28 = vld [vmem:[%s2299_s4] ss:$0 sm:$0xff] (!%p407_p9)  ;;  %v613_v34 = vld [vmem:[%s2300_s5 + $0x8] sm:$0xff] (!%p407_p9) }
  0x15   : > { %v1576_v25 = vpack.c.bf16 (!%p407_p9), %v484_v24, %v483_v23  ;;  %v612_v33 = vld [vmem:[%s2300_s5] sm:$0xff] (!%p407_p9)  ;;  %v614_v38 = vld [vmem:[%s2300_s5 + $0x10] sm:$0xff] (!%p407_p9)  ;;  %v615_v39 = vld [vmem:[%s2300_s5 + $0x18] sm:$0xff] (!%p407_p9) }
  0x16   : > { %1559 = vmatpush3.bf16.msra.mxu0 (!%p407_p9), %v1558_v7  ;;  %v1579_v37 = vpack.c.bf16 (!%p407_p9), %v613_v34, %v612_v33  ;;  %v1582_v40 = vpack.c.bf16 (!%p407_p9), %v615_v39, %v614_v38  ;;  %v616_v41 = vld [vmem:[%s2300_s5 + $0x20] sm:$0xff] (!%p407_p9)  ;;  %v617_v42 = vld [vmem:[%s2300_s5 + $0x28] sm:$0xff] (!%p407_p9)  ;;  %v618_v44 = vld [vmem:[%s2300_s5 + $0x30] sm:$0xff] (!%p407_p9) }
  0x17   : > { %1560 = vmatprep.subr.bf16.mxu0 %v1782_v3  ;;  %s1952_s17 = scalar_select %p455_p10, %s1877_s29, 1  ;;  %v1585_v43 = vpack.c.bf16 %v617_v42, %v616_v41  ;;  %v619_v45 = vld [vmem:[%s2300_s5 + $0x38] sm:$0xff]  ;;  %v620_v47 = vld [vmem:[%s2300_s5 + $0x40] sm:$0xff]  ;;  %v621_v48 = vld [vmem:[%s2300_s5 + $0x48] sm:$0xff] }
  0x18   : > { %v1588_v46 = vpack.c.bf16 %v619_v45, %v618_v44  ;;  %v1591_v49 = vpack.c.bf16 %v621_v48, %v620_v47  ;;  %v622_v50 = vld [vmem:[%s2300_s5 + $0x50] sm:$0xff]  ;;  %v623_v51 = vld [vmem:[%s2300_s5 + $0x58] sm:$0xff]  ;;  %v624_v53 = vld [vmem:[%s2300_s5 + $0x60] sm:$0xff]  ;;  %s1785_s29 = smov [#allocation2]  }
  0x19   : > { %s1250_s24 = sshll.u32 %s1952_s17, 2  ;;  %v1594_v52 = vpack.c.bf16 %v623_v51, %v622_v50  ;;  %v625_v54 = vld [vmem:[%s2300_s5 + $0x68] sm:$0xff]  ;;  %v626_v56 = vld [vmem:[%s2300_s5 + $0x70] sm:$0xff]  ;;  %v627_v57 = vld [vmem:[%s2300_s5 + $0x78] sm:$0xff]  ;;  %s1722_s23 = sshll.u32 %s1785_s29, 4  ;;  %s1723_s23 = int_to_ptr.vmem [resolvable:$false] %s1722_s23 }
  0x1a   : > { %1562 = vmatpush3.bf16.msra.mxu0 %v1561_v10  ;;  %s458_s21 = scalar_lea.vmem %s2295_s0, %s1250_s24  ;;  %s462_s30 = scalar_lea.vmem %s2296_s1, %s1250_s24  ;;  %v1597_v55 = vpack.c.bf16 %v625_v54, %v624_v53  ;;  %v1600_v58 = vpack.c.bf16 %v627_v57, %v626_v56  ;;  %v750_v63 = vld [vmem:[%s2302_s7] sm:$0xff]  ;;  %v751_v0 = vld [vmem:[%s2302_s7 + $0x8] sm:$0xff]  ;;  %v752_v1 = vld [vmem:[%s2302_s7 + $0x10] sm:$0xff] }
  0x1b   : > { %1563 = vmatprep.subr.bf16.mxu0 %v1782_v3  ;;  %v467_v26 = vld [vmem:[%s458_s21] sm:$0xf]  ;;  %v1603_v2 = vpack.c.bf16 %v751_v0, %v750_v63  ;;  %v753_v4 = vld [vmem:[%s2302_s7 + $0x18] sm:$0xff]  ;;  %v755_v8 = vld [vmem:[%s2302_s7 + $0x28] sm:$0xff]  ;;  %s465_s24 = scalar_lea.vmem %s2297_s2, %s1952_s17  ;;  %s453_s17 = sand.u32 1, %s1772_s26  }
  0x1c   : > { %v468_v27 = vunpack.c.l.bf16 %v467_v26  ;;  %v1989_v36 = vld [vmem:[%s462_s30] sm:$0xf]  ;;  %v1606_v5 = vpack.c.bf16 %v753_v4, %v752_v1  ;;  %v756_v10 = vld [vmem:[%s2302_s7 + $0x30] sm:$0xff]  ;;  %v757_v11 = vld [vmem:[%s2302_s7 + $0x38] sm:$0xff]  ;;  %s454_s16 = scalar_lea.vmem [#allocation2], %s453_s17  ;;  %s1724_s30 = scalar_lea.vmem %s1723_s23, 32 }
  0x1d   : > { %v754_v7 = vld [vmem:[%s2302_s7 + $0x20] sm:$0xff]  ;;  %v1612_v12 = vpack.c.bf16 %v757_v11, %v756_v10  ;;  %v759_v14 = vld [vmem:[%s2302_s7 + $0x48] sm:$0xff]  ;;  %v761_v17 = vld [vmem:[%s2302_s7 + $0x58] sm:$0xff]  ;;  %s1170_s20 = sshll.u32 %s454_s16, 4  ;;  %s2255_s20 = int_to_ptr.vmem [resolvable:$true] %s1170_s20 }
  0x1e   : > { %1565 = vmatpush3.bf16.msra.mxu0 %v1564_v13  ;;  %v1609_v9 = vpack.c.bf16 %v755_v8, %v754_v7  ;;  %v758_v13 = vld [vmem:[%s2302_s7 + $0x40] sm:$0xff]  ;;  %v763_v20 = vld [vmem:[%s2302_s7 + $0x68] sm:$0xff]  ;;  %v765_v23 = vld [vmem:[%s2302_s7 + $0x78] sm:$0xff]  ;;  %p1725_p0 = scmp.lt.s32.totalorder %s2255_s20, %s1723_s23 }
  0x1f   : > { %1566 = vmatprep.subr.bf16.mxu0 %v1782_v3  ;;  %v1615_v15 = vpack.c.bf16 %v759_v14, %v758_v13  ;;  %v889_v44 = vld [vmem:[%s2304_s9 + $0x8] sm:$0xff]  ;;  %v890_v47 = vld [vmem:[%s2304_s9 + $0x10] sm:$0xff]  ;;  %v891_v48 = vld [vmem:[%s2304_s9 + $0x18] sm:$0xff] }
  0x20   : > { %v892_v50 = vld [vmem:[%s2304_s9 + $0x20] sm:$0xff]  ;;  %v893_v51 = vld [vmem:[%s2304_s9 + $0x28] sm:$0xff]  ;;  %v895_v53 = vld [vmem:[%s2304_s9 + $0x38] sm:$0xff] }
  0x21   : > { %v897_v56 = vld [vmem:[%s2304_s9 + $0x48] sm:$0xff]  ;;  %v902_v0 = vld [vmem:[%s2304_s9 + $0x70] sm:$0xff]  ;;  %v903_v1 = vld [vmem:[%s2304_s9 + $0x78] sm:$0xff] }
  0x22   : > { %1568 = vmatpush3.bf16.msra.mxu0 %v1567_v16  ;;  %v760_v16 = vld [vmem:[%s2302_s7 + $0x50] sm:$0xff]  ;;  %v1068_v10 = vld [vmem:[%s2306_s11 + $0x8] sm:$0xff]  ;;  %v1070_v13 = vld [vmem:[%s2306_s11 + $0x18] sm:$0xff] }
  0x23   : > { %1569 = vmatprep.subr.bf16.mxu0 %v1782_v3  ;;  %v1618_v18 = vpack.c.bf16 %v761_v17, %v760_v16  ;;  %v1069_v11 = vld [vmem:[%s2306_s11 + $0x10] sm:$0xff]  ;;  %v1071_v14 = vld [vmem:[%s2306_s11 + $0x20] sm:$0xff] }
  0x24   : > { %v1073_v17 = vld [vmem:[%s2306_s11 + $0x30] sm:$0xff] }
  0x26   : > { %1571 = vmatpush3.bf16.msra.mxu0 %v1570_v19  ;;  %v762_v19 = vld [vmem:[%s2302_s7 + $0x60] sm:$0xff] }
  0x27   : > { %1572 = vmatprep.subr.bf16.mxu0 %v1782_v3  ;;  %v1621_v21 = vpack.c.bf16 %v763_v20, %v762_v19  ;;  %v1075_v20 = vld [vmem:[%s2306_s11 + $0x40] sm:$0xff] }
  0x2a   : > { %1574 = vmatpush3.bf16.msra.mxu0 %v1573_v22  ;;  %v764_v22 = vld [vmem:[%s2302_s7 + $0x70] sm:$0xff] }
  0x2b   : > { %1575 = vmatprep.subr.bf16.mxu0 %v1782_v3  ;;  %v1624_v24 = vpack.c.bf16 %v765_v23, %v764_v22  ;;  %v1077_v23 = vld [vmem:[%s2306_s11 + $0x50] sm:$0xff] }
  0x2e   : > { %1577 = vmatpush3.bf16.msra.mxu0 %v1576_v25  ;;  %v1254_v25 = vld [vmem:[%s2301_s6] ss:$0 sm:$0xff] }
  0x2f   : > { %1602 = vmatprep.subr.bf16.mxu0 %v1782_v3 }
  0x31   : > { %1389 = vmatmul.mubr.f32.vlgmr.msra.gmra.mrb[0].mxu0 %v468_v27 }
  0x32   : > { %1470 = vmatprep.mubr.msk.f32.mxu0 %vm1783_vm0, %v1784_v6  ;;  %1604 = vmatpush3.bf16.msra.mxu0 %v1603_v2  ;;  %v1648_v2 = vpack.c.bf16 %v903_v1, %v902_v0 }
  0x33   : > { %1605 = vmatprep.subr.bf16.mxu0 %v1782_v3 }
  0x36   : > { %1607 = vmatpush3.bf16.msra.mxu0 %v1606_v5 }
  0x37   : > { %1608 = vmatprep.subr.bf16.mxu0 %v1782_v3 }
  0x3a   : > { %1610 = vmatpush3.bf16.msra.mxu0 %v1609_v9  ;;  %v1067_v9 = vld [vmem:[%s2306_s11] sm:$0xff] }
  0x3b   : > { %1611 = vmatprep.subr.bf16.mxu0 %v1782_v3 }
  0x3e   : > { %1613 = vmatpush3.bf16.msra.mxu0 %v1612_v12  ;;  %v1651_v12 = vpack.c.bf16 %v1068_v10, %v1067_v9 }
  0x3f   : > { %1614 = vmatprep.subr.bf16.mxu0 %v1782_v3 }
  0x42   : > { %1616 = vmatpush3.bf16.msra.mxu0 %v1615_v15  ;;  %v1072_v15 = vld [vmem:[%s2306_s11 + $0x28] sm:$0xff] }
  0x43   : > { %1617 = vmatprep.subr.bf16.mxu0 %v1782_v3  ;;  %v1657_v16 = vpack.c.bf16 %v1072_v15, %v1071_v14 }
  0x46   : > { %1619 = vmatpush3.bf16.msra.mxu0 %v1618_v18  ;;  %v1074_v18 = vld [vmem:[%s2306_s11 + $0x38] sm:$0xff] }
  0x47   : > { %1620 = vmatprep.subr.bf16.mxu0 %v1782_v3  ;;  %v1660_v19 = vpack.c.bf16 %v1074_v18, %v1073_v17 }
  0x4a   : > { %1622 = vmatpush3.bf16.msra.mxu0 %v1621_v21  ;;  %v1076_v21 = vld [vmem:[%s2306_s11 + $0x48] sm:$0xff] }
  0x4b   : > { %1623 = vmatprep.subr.bf16.mxu0 %v1782_v3  ;;  %v1663_v22 = vpack.c.bf16 %v1076_v21, %v1075_v20 }
  0x4e   : > { %1625 = vmatpush3.bf16.msra.mxu0 %v1624_v24  ;;  %v1078_v24 = vld [vmem:[%s2306_s11 + $0x58] sm:$0xff] }
  0x4f   : > { %1650 = vmatprep.subr.bf16.mxu0 %v1782_v3 }
 0x104   : > { %v558_v29 = vpop.f32.mrb[0].mxu0 }
 0x105   : > { %v559_v30 = vadd.f32 %v1252_v28, %v558_v29  ;;  %v1390_v31 = vpop.f32.mrb[1].mxu0 }
 0x107   : > { %v563_v32 = vpack.c.bf16 %v559_v30, %v559_v30 }
 0x109   : > { %v570_v35 = vsel %vm568_vm1, %v563_v32, 0 }
 0x10a   : > { %1392 = vmatpush3.bf16.msra.mxu1 %v570_v35 }
 0x10b   : > { %1578 = vmatprep.subr.bf16.mxu1 %v1782_v3 }
 0x10d   : > { %1394 = vmatmul.mubr.msk.bf16.vlgmr.msra.gmra.mrb[0].mxu1 %vm564_vm2, %v1989_v36 }
 0x10e   : > { %1580 = vmatpush3.bf16.msra.mxu1 %v1579_v37  ;;  %1429 = vmatprep.mubr.msk.f32.mxu1 %vm1783_vm0, %v1784_v6  ;;  %v1256_v37 = vld [vmem:[%s2303_s8] ss:$0 sm:$0xff] }
 0x10f   : > { %1581 = vmatprep.subr.bf16.mxu1 %v1782_v3 }
 0x112   : > { %1583 = vmatpush3.bf16.msra.mxu1 %v1582_v40 }
 0x113   : > { %1584 = vmatprep.subr.bf16.mxu1 %v1782_v3 }
 0x116   : > { %1586 = vmatpush3.bf16.msra.mxu1 %v1585_v43  ;;  %v888_v43 = vld [vmem:[%s2304_s9] sm:$0xff] }
 0x117   : > { %1587 = vmatprep.subr.bf16.mxu1 %v1782_v3 }
 0x11a   : > { %1589 = vmatpush3.bf16.msra.mxu1 %v1588_v46  ;;  %v1627_v46 = vpack.c.bf16 %v889_v44, %v888_v43 }
 0x11b   : > { %1590 = vmatprep.subr.bf16.mxu1 %v1782_v3 }
 0x11e   : > { %1592 = vmatpush3.bf16.msra.mxu1 %v1591_v49  ;;  %v1630_v49 = vpack.c.bf16 %v891_v48, %v890_v47  ;;  %v1083_v48 = vld [vmem:[%s2307_s12] sm:$0x1] }
 0x11f   : > { %1593 = vmatprep.subr.bf16.mxu1 %v1782_v3 }
 0x122   : > { %1595 = vmatpush3.bf16.msra.mxu1 %v1594_v52  ;;  %v1633_v52 = vpack.c.bf16 %v893_v51, %v892_v50 }
 0x123   : > { %1596 = vmatprep.subr.bf16.mxu1 %v1782_v3 }
 0x126   : > { %1598 = vmatpush3.bf16.msra.mxu1 %v1597_v55  ;;  %v896_v55 = vld [vmem:[%s2304_s9 + $0x40] sm:$0xff] }
 0x127   : > { %1599 = vmatprep.subr.bf16.mxu1 %v1782_v3  ;;  %v1639_v57 = vpack.c.bf16 %v897_v56, %v896_v55 }
 0x12a   : > { %1601 = vmatpush3.bf16.msra.mxu1 %v1600_v58  ;;  %v898_v58 = vld [vmem:[%s2304_s9 + $0x50] sm:$0xff] }
 0x12b   : > { %1432 = vmatprep.subr.bf16.mxu1 %v1784_v6 }
 0x1e0   : > { %v606_v59 = vpop.f32.mrb[0].mxu1 }
 0x1e1   : > { %v1395_v60 = vpop.f32.mrb[1].mxu1  ;;  %1430 = vmatmul.mubr.f32.vlgmr.msra.gmra.mrb[4].mxu1 %v606_v59  ;;  %v899_v59 = vld [vmem:[%s2304_s9 + $0x58] sm:$0xff] }
 0x1e2   : > { %v609_v61 = vpop.f32.mrb[2].mxu1  ;;  %1434 = vmatprep.mubr.msk.bf16.mxu1 %vm1783_vm0, %v1784_v6  ;;  %v1642_v60 = vpack.c.bf16 %v899_v59, %v898_v58 }
 0x1e3   : > { %v1396_v62 = vpop.f32.mrb[3].mxu1  ;;  %v900_v61 = vld [vmem:[%s2304_s9 + $0x60] sm:$0xff] }
 0x1e4   : > { %v901_v62 = vld [vmem:[%s2304_s9 + $0x68] sm:$0xff] }
 0x1e5   : > { %v1645_v63 = vpack.c.bf16 %v901_v62, %v900_v61 }
 0x2b4   : > { %v701_v26 = vpop.f32.mrb[4].mxu1 }
 0x2b5   : > { %v702_v27 = vadd.f32 %v1254_v25, %v701_v26  ;;  %v1431_v28 = vpop.f32.mrb[5].mxu1  ;;  %v1666_v25 = vpack.c.bf16 %v1078_v24, %v1077_v23  ;;  %v1079_v26 = vld [vmem:[%s2306_s11 + $0x60] sm:$0xff] }
 0x2b7   : > { %v705_v29 = vmax.f32 %v702_v27, 0.0  ;;  %v1080_v27 = vld [vmem:[%s2306_s11 + $0x68] sm:$0xff] }
 0x2b8   : > { %v1669_v28 = vpack.c.bf16 %v1080_v27, %v1079_v26 }
 0x2b9   : > { %v706_v30 = vpack.c.bf16 %v705_v29, %v705_v29  ;;  %v1081_v29 = vld [vmem:[%s2306_s11 + $0x70] sm:$0xff] }
 0x2bb   : > { %v708_v31 = vsel %vm568_vm1, %v706_v30, 0  ;;  %v1082_v30 = vld [vmem:[%s2306_s11 + $0x78] sm:$0xff] }
 0x2bc   : > { %1433 = vmatpush3.bf16.msra.mxu1 %v708_v31  ;;  %v1672_v31 = vpack.c.bf16 %v1082_v30, %v1081_v29 }
 0x2bd   : > { %1473 = vmatprep.subr.bf16.mxu1 %v1784_v6 }
 0x2bf   : > { %1435 = vmatmul.mubr.msk.bf16.vlgmr.msra.gmra.mrb[8].mxu1 %vm564_vm2, %v1989_v36 }
 0x2c0   : > { %1475 = vmatprep.mubr.msk.bf16.mxu1 %vm1783_vm0, %v1784_v6 }
 0x392   : > { %v744_v32 = vpop.f32.mrb[8].mxu1 }
 0x393   : > { %v1436_v33 = vpop.f32.mrb[9].mxu1  ;;  %1471 = vmatmul.mubr.f32.vlgmr.msra.gmra.mrb[2].mxu0 %v744_v32  ;;  %v1258_v32 = vld [vmem:[%s2305_s10] ss:$0 sm:$0xff] }
 0x394   : > { %v747_v34 = vpop.f32.mrb[10].mxu1  ;;  %1551 = vmatprep.mubr.msk.f32.mxu0 %vm1783_vm0, %v1784_v6  ;;  %1652 = vmatpush3.bf16.msra.mxu0 %v1651_v12 }
 0x395   : > { %v1437_v35 = vpop.f32.mrb[11].mxu1  ;;  %1653 = vmatprep.subr.bf16.mxu0 %v1782_v3 }
 0x466   : > { %v839_v38 = vpop.f32.mrb[2].mxu0 }
 0x467   : > { %v840_v39 = vadd.f32 %v1256_v37, %v839_v38  ;;  %v1472_v40 = vpop.f32.mrb[3].mxu0  ;;  %v982_v38 = vld [vmem:[%s465_s24] sm:$0x1]  ;;  %s1158_s24 = scalar_lea.sflag [#allocation3], %s453_s17 }
 0x469   : > { %v843_v41 = vmax.f32 %v840_v39, 0.0 }
 0x46b   : > { %v844_v42 = vpack.c.bf16 %v843_v41, %v843_v41 }
 0x46d   : > { %v846_v45 = vsel %vm568_vm1, %v844_v42, 0 }
 0x46e   : > { %1474 = vmatpush3.bf16.msra.mxu1 %v846_v45 }
 0x46f   : > { %1626 = vmatprep.subr.bf16.mxu1 %v1782_v3 }
 0x471   : > { %1476 = vmatmul.mubr.msk.bf16.vlgmr.msra.gmra.mrb[12].mxu1 %vm564_vm2, %v1989_v36  ;;  %v894_v36 = vld [vmem:[%s2304_s9 + $0x30] sm:$0xff] }
 0x472   : > { %1628 = vmatpush3.bf16.msra.mxu1 %v1627_v46  ;;  %1511 = vmatprep.mubr.msk.f32.mxu1 %vm1783_vm0, %v1784_v6  ;;  %v1636_v54 = vpack.c.bf16 %v895_v53, %v894_v36 }
 0x473   : > { %1629 = vmatprep.subr.bf16.mxu1 %v1782_v3 }
 0x476   : > { %1631 = vmatpush3.bf16.msra.mxu1 %v1630_v49 }
 0x477   : > { %1632 = vmatprep.subr.bf16.mxu1 %v1782_v3 }
 0x47a   : > { %1634 = vmatpush3.bf16.msra.mxu1 %v1633_v52 }
 0x47b   : > { %1635 = vmatprep.subr.bf16.mxu1 %v1782_v3 }
 0x47e   : > { %1637 = vmatpush3.bf16.msra.mxu1 %v1636_v54 }
 0x47f   : > { %1638 = vmatprep.subr.bf16.mxu1 %v1782_v3 }
 0x482   : > { %1640 = vmatpush3.bf16.msra.mxu1 %v1639_v57 }
 0x483   : > { %1641 = vmatprep.subr.bf16.mxu1 %v1782_v3 }
 0x486   : > { %1643 = vmatpush3.bf16.msra.mxu1 %v1642_v60 }
 0x487   : > { %1644 = vmatprep.subr.bf16.mxu1 %v1782_v3 }
 0x48a   : > { %1646 = vmatpush3.bf16.msra.mxu1 %v1645_v63 }
 0x48b   : > { %1647 = vmatprep.subr.bf16.mxu1 %v1782_v3 }
 0x48e   : > { %1649 = vmatpush3.bf16.msra.mxu1 %v1648_v2 }
 0x48f   : > { %1514 = vmatprep.subr.mxu1 %v1784_v6 }
 0x544   : > { %v882_v4 = vpop.f32.mrb[12].mxu1 }
 0x545   : > { %v1477_v5 = vpop.f32.mrb[13].mxu1  ;;  %1512 = vmatmul.mubr.f32.vlgmr.msra.gmra.mrb[6].mxu1 %v882_v4 }
 0x546   : > { %v885_v7 = vpop.f32.mrb[14].mxu1  ;;  %1516 = vmatprep.mubr.msk.f32.mxu1 %vm1783_vm0, %v1784_v6  ;;  %v1654_v6 = vpack.c.bf16 %v1070_v13, %v1069_v11 }
 0x547   : > { %v1478_v8 = vpop.f32.mrb[15].mxu1 }
 0x548   : > { %1655 = vmatpush3.bf16.msra.mxu0 %v1654_v6 }
 0x549   : > { %1656 = vmatprep.subr.bf16.mxu0 %v1782_v3 }
 0x54c   : > { %1658 = vmatpush3.bf16.msra.mxu0 %v1657_v16 }
 0x54d   : > { %1659 = vmatprep.subr.bf16.mxu0 %v1782_v3 }
 0x550   : > { %1661 = vmatpush3.bf16.msra.mxu0 %v1660_v19 }
 0x551   : > { %1662 = vmatprep.subr.bf16.mxu0 %v1782_v3 }
 0x554   : > { %1664 = vmatpush3.bf16.msra.mxu0 %v1663_v22 }
 0x555   : > { %1665 = vmatprep.subr.bf16.mxu0 %v1782_v3 }
 0x558   : > { %1667 = vmatpush3.bf16.msra.mxu0 %v1666_v25 }
 0x559   : > { %1668 = vmatprep.subr.bf16.mxu0 %v1782_v3 }
 0x55c   : > { %1670 = vmatpush3.bf16.msra.mxu0 %v1669_v28 }
 0x55d   : > { %1671 = vmatprep.subr.bf16.mxu0 %v1782_v3  ;;  %v1057_v3 = vsel %vm1056_vm3, %v982_v38, 0.0 }
 0x55e   : > { %1058 = vadd.xlane.f32.xlu0 %v1057_v3 }
 0x560   : > { %1673 = vmatpush3.bf16.msra.mxu0 %v1672_v31 }
 0x5eb   : > { %v1059_v41 = vpop.xlane.xlu0 %1058 }
 0x5ec   : > { %v1060_v42 = vrot.slane %v1059_v41, 4 }
 0x5ee   : > { %v1061_v43 = vadd.f32 %v1060_v42, %v1059_v41 }
 0x5f0   : > { %v1062_v44 = vrot.slane %v1061_v43, 2 }
 0x5f2   : > { %v1063_v45 = vadd.f32 %v1062_v44, %v1061_v43 }
 0x5f4   : > { %v1064_v46 = vrot.slane %v1063_v45, 1 }
 0x5f6   : > { %v1065_v47 = vadd.f32 %v1064_v46, %v1063_v45 }
 0x5f8   : > { %1674 = vpush %v1065_v47 }
 0x618   : > { %v977_v33 = vpop.f32.mrb[6].mxu1 }
 0x619   : > { %v978_v34 = vadd.f32 %v1258_v32, %v977_v33  ;;  %v1513_v35 = vpop.f32.mrb[7].mxu1 }
 0x61b   : > { %v981_v37 = vmax.f32 %v978_v34, 0.0 }
 0x61d   : > { %1515 = vmatpush3.msra.mxu1 %v981_v37 }
 0x61e   : > { %1517 = vmatmul.mubr.msk.f32.vlgmr.msra.gmra.mrb[16].mxu1 %vm564_vm2, %v982_v38 }
 0x629   : > { %s1675_s14 = spop %1674 }
 0x62a   : > { %v1084_v49 = vstv %s1675_s14  ;;  %s1718_s14 = scalar_lea.vmem %s2255_s20, 16 }
 0x62b   : > { %v1085_v50 = vmul.f32 %v1084_v49, %v1083_v48  ;;  %p1719_p11 = scmp.ne.s32.totalorder %s2255_s20, %s1718_s14  ;;  %p1726_p1 = scmp.lt.s32.totalorder %s1724_s30, %s1718_s14 }
 0x62d   : > { %p1720_p12 = pnand %p1719_p11, %p1894_p5  ;;  %p1727_p2 = por %p1726_p1, %p1725_p0 }
 0x62f   : > { %p1721_p13 = pneg %p1720_p12 }
 0x631   : > { %p1728_p3 = pnand %p1727_p2, %p1721_p13 }
 0x6f1   : > { %v1052_v39 = vpop.f32.mrb[16].mxu1 }
 0x6f2   : > { %1552 = vmatmul.mubr.f32.vlgmr.msra.gmra.mrb[4].mxu0 %v1052_v39  ;;  %v1518_v40 = vpop.f32.mrb[17].mxu1 }
 0x7c5   : > { %v1152_v51 = vpop.f32.mrb[4].mxu0 }
 0x7c6   : > { %v1153_v52 = vadd.f32 %v1152_v51, %v1085_v50  ;;  %v1553_v36 = vpop.f32.mrb[5].mxu0 }
 0x7c8   : > { %1156 = vst [vmem:[%s454_s16] sm:$0x1] %v1153_v52 }
 0x7c9   : > { %1731 = shalt.err (!%p1728_p3)
}
 0x7ca   : > { %s1732_s17 = scalar_lea.hbm %s2253_s27, 16  ;;  %s1736_s21 = scalar_lea.hbm %s2308_s13, 32 }
 0x7cb   : > { %p1733_p4 = scmp.ne.s32.totalorder %s2253_s27, %s1732_s17  ;;  %p1737_p9 = scmp.lt.u32.totalorder %s2253_s27, %s2308_s13 }
 0x7cc   : > { %p1738_p10 = scmp.lt.u32.totalorder %s1736_s21, %s1732_s17  ;;  %p1740_p12 = scmp.lt.u32.totalorder %s1732_s17, %s2253_s27 }
 0x7cd   : > { %p1734_p7 = pnand %p1733_p4, %p1894_p5 }
 0x7ce   : > { %p1739_p11 = por %p1738_p10, %p1737_p9 }
 0x7cf   : > { %p1735_p8 = pneg %p1734_p7 }
 0x7d0   : > { %p1741_p13 = por %p1740_p12, %p1739_p11 }
 0x7d2   : > { %p1742_p0 = pnand %p1741_p13, %p1735_p8 }
 0x7d4   : > { %1745 = shalt.err (!%p1742_p0)
}
 0x7d5   : > { %1676 = dma.vmem_to_hbm [thread:$0]  (%p1894_p5), %s2255_s20, 16, %s2253_s27, %s1158_s24  }
 0x7d6 PF: > { %p1682_p1 = scmp.ge.s32.totalorder %s1780_s28, 2  ;;  %s1182_s14 = sand.u32 1, %s1768_s25  }
 0x7d7   : > { %s1183_s23 = scalar_lea.sflag [#allocation3], %s1182_s14 }
 0x7d8   : > { %p1679_p2 = pnand %p1682_p1, %p1898_p6 }
 0x7da   : > { %1763 = dma.done.wait (!%p1679_p2), %s1183_s23, 16  }
 0x7db   : > { %1765 = vsyncadd (!%p1679_p2), %s1183_s23, 4294967280  ;;  %s2317_s28 = sld [smem:[#allocation6_spill]]  ;;  %s2318_s30 = sld [smem:[#allocation5_spill]] }
 0x7dc   : > { %s2319_s27 = sld [smem:[#allocation7_spill]]  ;;  %s2320_s25 = smov %s1772_s26 }
 0x7e1   : > { %p23_p3 = scmp.ge.s32.totalorder %s2317_s28, 4   ;;  %s2321_s26 = smov %s2318_s30 }
 0x7e3   :  { %25 = sbr.rel (!%p23_p3) target bundleno = 3 (0x3), region = 113 }
 0x7ea   :  { %1187 = vsyncpa [#allocation3], 1 }
 0x7eb   :  { %1189 = vsyncpa [#allocation3 + $0x1], 1 }

</bundles_post_ra>
